<compile_context>
chip_gen: v7x
topology: tpu7x:2x2x1
jax: 0.10.0
libtpu: 0.0.40
codegen_flags: <defaults>
</compile_context>

<pallas_src>
import math
import functools

import jax
import jax.numpy as jnp
from jax.experimental import pallas as pl
from jax.experimental.pallas import tpu as pltpu


def _entropy_kernel(x_ref, part_ref, acc_ref, *, eps, multi_col,
                    n_valid_rows, ragged_rows):
    """Accumulate sum(x * log(x + eps)) for one (row, col) block.

    x_ref    : (row_block, col_block) input tile.
    part_ref : (1, 8, 128) per-row-block partial-sum output (lane dense;
               the scalar is broadcast, host reads [:, 0, 0]).
    acc_ref  : VMEM f32 scratch accumulator (tile-shaped when multi_col).
    """
    x = x_ref[...].astype(jnp.float32)

    if ragged_rows:
        # Tail row block extends past N: zero the out-of-bounds rows so they
        # contribute exactly 0 * log(eps) == 0 (cheap (row_block,1) sublane
        # iota + lane-broadcast select; pure VPU work).
        row_block = x_ref.shape[0]
        base = pl.program_id(0) * row_block
        rows = base + jax.lax.broadcasted_iota(jnp.int32, (row_block, 1), 0)
        x = jnp.where(rows < n_valid_rows, x, 0.0)

    contrib = x * jnp.log(x + eps)          # VPU mul + EUP log, f32

    if not multi_col:
        # Single column block: each grid step covers a full row block.
        total = jnp.sum(contrib)            # one reduce per row block
        part_ref[...] = jnp.zeros(part_ref.shape, jnp.float32) + total
    else:
        j = pl.program_id(1)

        @pl.when(j == 0)
        def _():
            acc_ref[...] = jnp.zeros_like(acc_ref)

        # Pure elementwise VPU accumulate; no cross-lane work per step.
        acc_ref[...] += contrib

        @pl.when(j == pl.num_programs(1) - 1)
        def _():
            total = jnp.sum(acc_ref[...])   # epilogue-only reduce to scalar
            part_ref[...] = jnp.zeros(part_ref.shape, jnp.float32) + total


def _round_up(v, m):
    return ((v + m - 1) // m) * m


def _largest_divisor_multiple(dim, quantum, cap):
    """Largest b <= cap with b % quantum == 0 and dim % b == 0 (or None)."""
    best = None
    b = quantum
    cap = min(cap, dim)
    while b <= cap:
        if dim % b == 0:
            best = b
        b += quantum
    return best


def _choose_blocks(n_rows, n_cols, target_block_bytes, col_cap=2048):
    # Column (lane) block: full C unless C is large and 128-divisible.
    if n_cols % 128 == 0 and n_cols > col_cap:
        col_block = _largest_divisor_multiple(n_cols, 128, col_cap) or n_cols
    else:
        col_block = n_cols
    # Row (sublane) block: size by *lane-padded* f32 VMEM footprint so narrow
    # C doesn't blow up VMEM (last dim is padded to 128 lanes on chip).
    padded_col = _round_up(col_block, 128)
    row_cap = max(8, target_block_bytes // (padded_col * 4))
    if n_rows <= row_cap:
        row_block = n_rows                          # full dim: always legal
    elif n_rows % 8 == 0:
        row_block = (_largest_divisor_multiple(n_rows, 8, row_cap)
                     or (row_cap // 8) * 8)
    else:
        row_block = (row_cap // 8) * 8              # ragged tail, masked in-kernel
    return row_block, col_block


def entropy_loss(x, eps=1e-8, *, row_block=None, col_block=None,
                 target_block_bytes=2 * 1024 * 1024):
    """Pallas implementation of EntropyLoss.forward(x, eps). x: (N, C)."""
    N, C = x.shape
    logN = math.log(float(N))

    auto_rb, auto_cb = _choose_blocks(N, C, target_block_bytes)
    row_block = auto_rb if row_block is None else row_block
    col_block = auto_cb if col_block is None else col_block
    assert C % col_block == 0
    assert col_block % 128 == 0 or col_block == C
    assert row_block % 8 == 0 or row_block == N

    num_row_blocks = pl.cdiv(N, row_block)
    num_col_blocks = C // col_block
    multi_col = num_col_blocks > 1
    ragged_rows = (N % row_block) != 0
    acc_shape = (row_block, col_block) if multi_col else (8, 128)

    kernel = functools.partial(
        _entropy_kernel, eps=float(eps), multi_col=multi_col,
        n_valid_rows=N, ragged_rows=ragged_rows)

    part = pl.pallas_call(
        kernel,
        out_shape=jax.ShapeDtypeStruct((num_row_blocks, 8, 128), jnp.float32),
        grid_spec=pltpu.PrefetchScalarGridSpec(
            num_scalar_prefetch=0,
            grid=(num_row_blocks, num_col_blocks),
            in_specs=[pl.BlockSpec((row_block, col_block),
                                   lambda i, j: (i, j))],
            out_specs=pl.BlockSpec((1, 8, 128), lambda i, j: (i, 0, 0)),
            scratch_shapes=[pltpu.VMEM(acc_shape, jnp.float32)],
        ),
        compiler_params=pltpu.CompilerParams(
            # Row blocks are independent -> "parallel" (dual-TC on v7x);
            # the column/reduction axis is last and "arbitrary".
            dimension_semantics=("parallel", "arbitrary"),
            vmem_limit_bytes=32 * 1024 * 1024,
        ),
        cost_estimate=pl.CostEstimate(
            flops=3 * N * C,
            transcendentals=N * C,
            bytes_accessed=N * C * x.dtype.itemsize
            + num_row_blocks * 8 * 128 * 4,
        ),
    )(x)

    # Tiny final reduce + scale/negate in plain JAX.
    total = part[:, 0, 0].sum()
    return -total / jnp.float32(logN * float(N))


def entropy_loss_ref(x, eps=1e-8):
    """Pure-JAX reference mirroring the PyTorch module exactly."""
    logN = math.log(float(x.shape[0]))
    xx = x * jnp.log(x + eps) / logN
    return -(xx.sum(1)).mean()


if __name__ == "__main__":
    # EntropyLoss has no parameters; rows of x are probability distributions.
    key = jax.random.PRNGKey(0)
    N, C = 16, 128
    logits = jax.random.normal(key, (N, C), dtype=jnp.float32)
    x = jax.nn.softmax(logits, axis=1)

    out = jax.block_until_ready(entropy_loss(x))
    ref = entropy_loss_ref(x)
    assert jnp.allclose(out, ref, rtol=1e-5, atol=1e-6), (out, ref)

    # Tiled path: multiple row blocks + multiple column blocks (VMEM
    # accumulator + epilogue reduce).
    N2, C2 = 64, 512
    x2 = jax.nn.softmax(
        jax.random.normal(jax.random.PRNGKey(1), (N2, C2), jnp.float32), axis=1)
    out2 = jax.block_until_ready(
        entropy_loss(x2, row_block=16, col_block=128))
    ref2 = entropy_loss_ref(x2)
    assert jnp.allclose(out2, ref2, rtol=1e-5, atol=1e-6), (out2, ref2)

    # Ragged path: N not a multiple of the row block -> in-kernel tail mask
    # (no HBM pad copy).
    N3, C3 = 20, 256
    x3 = jax.nn.softmax(
        jax.random.normal(jax.random.PRNGKey(2), (N3, C3), jnp.float32), axis=1)
    out3 = jax.block_until_ready(
        entropy_loss(x3, row_block=8, col_block=128))
    ref3 = entropy_loss_ref(x3)
    assert jnp.allclose(out3, ref3, rtol=1e-5, atol=1e-6), (out3, ref3)

    print("KERNEL_OK")
</pallas_src>

<mosaic_0001>
module attributes {stable_mosaic.version = 11 : i64} {
  func.func @_entropy_kernel(%arg0: i32, %arg1: i32, %arg2: memref<16x128xf32, #tpu.memory_space<vmem>>, %arg3: memref<1x8x128xf32, #tpu.memory_space<vmem>>, %arg4: memref<8x128xf32, #tpu.memory_space<vmem>>) attributes {dimension_semantics = [#tpu.dimension_semantics<parallel>, #tpu.dimension_semantics<arbitrary>], iteration_bounds = array<i64: 1, 1>, scalar_prefetch = 0 : i64, scratch_operands = 1 : i64, tpu.core_type = #tpu.core_type<tc>, window_params = [{transform_indices = @transform_0, window_bounds = array<i64: 16, 128>}, {transform_indices = @transform_1, window_bounds = array<i64: 1, 8, 128>}]} {
    %c0 = arith.constant 0 : index
    %c0_0 = arith.constant 0 : index
    %0 = vector.load %arg2[%c0, %c0_0] : memref<16x128xf32, #tpu.memory_space<vmem>>, vector<16x128xf32>
    %cst = arith.constant 9.99999993E-9 : f32
    %1 = vector.broadcast %cst : f32 to vector<16x128xf32>
    %2 = arith.addf %0, %1 : vector<16x128xf32>
    %3 = math.log %2 : vector<16x128xf32>
    %4 = arith.mulf %0, %3 : vector<16x128xf32>
    %5 = vector.shape_cast %4 : vector<16x128xf32> to vector<1x16x128xf32>
    %cst_1 = arith.constant dense<0.000000e+00> : vector<1xf32>
    %6 = vector.multi_reduction <add>, %5, %cst_1 [1, 2] : vector<1x16x128xf32> to vector<1xf32>
    %7 = vector.shape_cast %6 : vector<1xf32> to vector<1x1x1xf32>
    %8 = vector.extract %7[0, 0, 0] : f32 from vector<1x1x1xf32>
    %cst_2 = arith.constant 0.000000e+00 : f32
    %9 = vector.broadcast %cst_2 : f32 to vector<1x8x128xf32>
    %10 = vector.broadcast %8 : f32 to vector<1x8x128xf32>
    %11 = arith.addf %9, %10 : vector<1x8x128xf32>
    %c0_3 = arith.constant 0 : index
    %c0_4 = arith.constant 0 : index
    %c0_5 = arith.constant 0 : index
    %12 = vector.load %arg3[%c0_3, %c0_4, %c0_5] : memref<1x8x128xf32, #tpu.memory_space<vmem>>, vector<1x8x128xf32>
    tpu.vector_store %arg3[%c0_3, %c0_4, %c0_5], %11 {strides = array<i32>} : memref<1x8x128xf32, #tpu.memory_space<vmem>>, vector<1x8x128xf32>,
    return
  }
  func.func @transform_0(%arg0: i32, %arg1: i32) -> (i32, i32) {
    %c0_i32 = arith.constant 0 : i32
    return %arg0, %arg1 : i32, i32
  }
  func.func @transform_1(%arg0: i32, %arg1: i32) -> (i32, i32, i32) {
    %c0_i32 = arith.constant 0 : i32
    %c0_i32_0 = arith.constant 0 : i32
    %c0_i32_1 = arith.constant 0 : i32
    return %arg0, %c0_i32, %c0_i32_0 : i32, i32, i32
  }
}

</mosaic_0001>

<bundles_post_ra>
// kernel: tpu_custom_call.1
= control target key start
LH: loop header
LB: loop body
LE: loop exit
PB: predicated region body
PF: predicated region fallthrough
CT: control target
= control target key end

     0   :  { %6 = vsyncpa [#allocation4], 0  ;;  %s157_s0 = inlined_call_operand.hbm [shape: f32[16,128], index: 0, kind: input, shape index: {}]   ;;  %s158_s1 = inlined_call_operand.hbm [shape: f32[1,8,128], index: 1, kind: output, shape index: {}]  }
   0x1   :  { %7 = vsyncpa [#allocation5], 0  ;;  %s119_s6 = smov [#allocation3]   ;;  %s71_s10 = scalar_lea.hbm %s157_s0, 256 }
   0x2   :  { %s13_s7 = sshll.u32 %s119_s6, 4  ;;  %p72_p0 = scmp.ne.s32.totalorder %s157_s0, %s71_s10  ;;  %s14_s7 = int_to_ptr.vmem [resolvable:$true] %s13_s7 }
   0x3   :  { %p75_p1 = scmp.lt.u32.totalorder %s71_s10, %s157_s0 }
   0x5   :  { %p77_p2 = pnand %p75_p1, %p72_p0 }
   0x7   :  { %80 = shalt.err (!%p77_p2)
}
   0x8   :  { %s81_s15 = scalar_lea.vmem %s14_s7, 256  ;;  %p86_p4 = scmp.lt.s32.totalorder %s14_s7, %s14_s7 }
   0x9   :  { %p82_p3 = scmp.ne.s32.totalorder %s14_s7, %s81_s15  ;;  %p87_p5 = scmp.lt.s32.totalorder %s81_s15, %s81_s15 }
   0xb   :  { %p88_p6 = por %p87_p5, %p86_p4 }
   0xd   :  { %p89_p7 = pnand %p88_p6, %p82_p3 }
   0xf   :  { %92 = shalt.err (!%p89_p7)
}
  0x10   :  { %s120_s16 = smov 128   ;;  %s121_s17 = smov 8  }
  0x11   :  { %19 = dma.hbm_to_vmem [thread:$0]  %s157_s0, 256, %s14_s7, [#allocation4], %s120_s16, %s120_s16, %s121_s17  }
  0x12   :  { %115 = dma.done.wait [#allocation4], 256  }
  0x13   :  { %116 = vsyncadd [#allocation4], 4294967040  ;;  %v23_v0 = vld [vmem:[#allocation3] sm:$0xff]  ;;  %v24_v1 = vld [vmem:[#allocation3 + $0x8] sm:$0xff]  ;;  %s122_s0 = smov [#allocation6]  }
  0x14   :  { %v25_v2 = vadd.f32 1e-08, %v23_v0  ;;  %v26_v3 = vadd.f32 1e-08, %v24_v1  ;;  %s52_s20 = sshll.u32 %s122_s0, 4  ;;  %s53_s20 = int_to_ptr.vmem [resolvable:$true] %s52_s20 }
  0x15   :  { %s93_s22 = scalar_lea.vmem %s53_s20, 128  ;;  %p98_p9 = scmp.lt.s32.totalorder %s53_s20, %s53_s20 }
  0x16   :  { %67 = vlog2.f32 %v25_v2  ;;  %p94_p8 = scmp.ne.s32.totalorder %s53_s20, %s93_s22  ;;  %p99_p10 = scmp.lt.s32.totalorder %s93_s22, %s93_s22 }
  0x17   :  { %69 = vlog2.f32 %v26_v3 }
  0x18   :  { %p100_p11 = por %p99_p10, %p98_p9 }
  0x1a   :  { %p101_p12 = pnand %p100_p11, %p94_p8 }
  0x20   :  { %v68_v4 = vpop.eup %67 }
  0x21   :  { %v70_v5 = vpop.eup %69  ;;  %v28_v6 = vmul.f32 0.6931472, %v68_v4 }
  0x22   :  { %v30_v7 = vmul.f32 0.6931472, %v70_v5 }
  0x23   :  { %v31_v8 = vmul.f32 %v28_v6, %v23_v0 }
  0x24   :  { %v32_v9 = vmul.f32 %v30_v7, %v24_v1 }
  0x26   :  { %v33_v10 = vadd.f32 %v32_v9, %v31_v8 }
  0x28   :  { %34 = vadd.xlane.f32.xlu0 %v33_v10 }
  0xb5   :  { %v35_v11 = vpop.xlane.xlu0 %34 }
  0xb6   :  { %v36_v12 = vrot.slane %v35_v11, 4 }
  0xb8   :  { %v37_v13 = vadd.f32 %v36_v12, %v35_v11 }
  0xba   :  { %v38_v14 = vrot.slane %v37_v13, 2 }
  0xbc   :  { %v39_v15 = vadd.f32 %v38_v14, %v37_v13 }
  0xbe   :  { %v40_v16 = vrot.slane %v39_v15, 1 }
  0xc0   :  { %v41_v17 = vadd.f32 %v40_v16, %v39_v15 }
  0xc2   :  { %61 = vpush %v41_v17 }
  0xf3   :  { %s62_s21 = spop %61 }
  0xf4   :  { %v43_v18 = vstv %s62_s21 }
  0xf5   :  { %45 = vst [vmem:[#allocation6] sm:$0xff] %v43_v18 }
  0xf6   :  { %104 = shalt.err (!%p101_p12)
}
  0xf7   :  { %s105_s25 = scalar_lea.hbm %s158_s1, 128 }
  0xf8   :  { %p106_p13 = scmp.ne.s32.totalorder %s158_s1, %s105_s25  ;;  %p109_p0 = scmp.lt.u32.totalorder %s105_s25, %s158_s1 }
  0xfa   :  { %p111_p1 = pnand %p109_p0, %p106_p13 }
  0xfc   :  { %114 = shalt.err (!%p111_p1)
}
  0xfd   :  { %55 = dma.vmem_to_hbm [thread:$0]  %s53_s20, 128, %s158_s1, [#allocation5]  }
  0xfe   :  { %117 = dma.done.wait [#allocation5], 128  }
  0xff   :  { %118 = vsyncadd [#allocation5], 4294967168 }
 0x100   :  { %59 = vsyncpa [#allocation4], 1 }
 0x101   :  { %60 = vsyncpa [#allocation5], 1 }

</bundles_post_ra>
